<compile_context>
chip_gen: v7x
topology: tpu7x:2x2x1
jax: 0.10.0
libtpu: 0.0.40
codegen_flags: <defaults>
</compile_context>

<pallas_src>
import functools

import jax
import jax.numpy as jnp
from jax.experimental import pallas as pl
from jax.experimental.pallas import tpu as pltpu


def _round_up(x, m):
    return ((x + m - 1) // m) * m


def actor_kernel(x_ref, w1_ref, b1_ref, w2_ref, b2_ref, w3_ref, b3_ref,
                 mean_ref, *, a_dim):
    x = x_ref[...]                                                       # [TB, S]
    h1 = jnp.dot(x, w1_ref[...], preferred_element_type=jnp.float32)    # [TB, H]
    h1 = jnp.maximum(h1 + b1_ref[...], 0.0)                             # ReLU
    h2 = jnp.dot(h1, w2_ref[...], preferred_element_type=jnp.float32)   # [TB, H]
    h2 = jnp.maximum(h2 + b2_ref[...], 0.0)                             # ReLU
    m = jnp.dot(h2, w3_ref[...], preferred_element_type=jnp.float32)    # [TB, Ap]
    m = m + b3_ref[...]
    # Narrow store: only the A real action lanes go to HBM (masked vst; the
    # vector-store slot has huge slack here, DMA bytes are what matter).
    mean_ref[...] = jnp.tanh(m[:, :a_dim]).astype(mean_ref.dtype)


def _actor_call(state_rows, w1, b1, w2, b2, w3p, b3p, a_dim, tb):
    """Runs the Actor MLP over the floor(n_rows/tb)*tb leading rows of state_rows."""
    n_rows, s_dim = state_rows.shape
    h_dim = w1.shape[1]
    ap = w3p.shape[1]
    n_main = (n_rows // tb) * tb          # rows covered by complete tiles
    grid = (n_main // tb,)
    const2 = lambda i: (0, 0)             # weights/biases stay resident across grid

    return pl.pallas_call(
        functools.partial(actor_kernel, a_dim=a_dim),
        out_shape=jax.ShapeDtypeStruct((n_main, a_dim), jnp.float32),
        grid=grid,
        in_specs=[
            pl.BlockSpec((tb, s_dim), lambda i: (i, 0)),   # state tile moves with grid
            pl.BlockSpec((s_dim, h_dim), const2),          # w1
            pl.BlockSpec((1, h_dim), const2),              # b1
            pl.BlockSpec((h_dim, h_dim), const2),          # w2
            pl.BlockSpec((1, h_dim), const2),              # b2
            pl.BlockSpec((h_dim, ap), const2),             # w3 (lane-padded, compute only)
            pl.BlockSpec((1, ap), const2),                 # b3 (lane-padded, compute only)
        ],
        out_specs=pl.BlockSpec((tb, a_dim), lambda i: (i, 0)),
        compiler_params=pltpu.CompilerParams(
            dimension_semantics=("parallel",),             # megacore on v7x
        ),
    )(state_rows, w1, b1, w2, b2, w3p, b3p)


def _choose_tb(batch, tb_max):
    """Batch tile: multiple of 8, large (amortize ~0.35us/step), >=2 grid steps if possible."""
    tb_max = max(8, (tb_max // 8) * 8)
    if batch < 16:
        return 8
    tb = min(tb_max, (batch // 8) * 8)
    if batch // tb < 2:                       # keep both v7x TensorCores busy
        tb = max(8, ((tb // 2) // 8) * 8)
    return tb


def actor_forward(state, params, *, tb_max=4096):
    """Returns (action_mean [B, A], logstd [1, A]) matching the PyTorch module."""
    w1, b1, w2, b2, w3, b3, logstd = (
        params["w1"], params["b1"], params["w2"], params["b2"],
        params["w3"], params["b3"], params["logstd"],
    )
    B, S = state.shape
    H = w1.shape[1]
    A = w3.shape[1]

    # Lane-dense pad of the action head for the MXU feed only; the HBM output
    # stays A lanes wide.
    Ap = max(128, _round_up(A, 128))
    w3p = jnp.zeros((H, Ap), w3.dtype).at[:, :A].set(w3)
    b3p = jnp.zeros((1, Ap), b3.dtype).at[:, :A].set(b3)

    TB = _choose_tb(B, tb_max)
    B_main = (B // TB) * TB
    tail = B - B_main

    outs = []
    if B_main > 0:
        # No input copy: the full state array goes straight in; the grid only
        # touches the complete (TB, S) tiles.
        outs.append(_actor_call(state, w1, b1, w2, b2, w3p, b3p, A, TB))
    if tail > 0:
        # Pad only the tail rows (< TB of them) up to a multiple of 8.
        TBt = _round_up(tail, 8)
        tail_rows = state[B_main:]
        if TBt != tail:
            tail_rows = jnp.zeros((TBt, S), state.dtype).at[:tail].set(tail_rows)
        out_tail = _actor_call(tail_rows, w1, b1, w2, b2, w3p, b3p, A, TBt)
        outs.append(out_tail[:tail])

    action_mean = outs[0] if len(outs) == 1 else jnp.concatenate(outs, axis=0)

    # l_logstd is a plain parameter returned untouched (no kernel work needed).
    return action_mean, logstd


def init_params(key, state_dim, action_dim, hidden=64):
    """Deterministic init mimicking PyTorch Linear default (uniform +-1/sqrt(fan_in))."""
    ks = jax.random.split(key, 6)

    def linear(kw, kb, fan_in, fan_out):
        bound = 1.0 / jnp.sqrt(fan_in)
        w = jax.random.uniform(kw, (fan_in, fan_out), jnp.float32, -bound, bound)
        b = jax.random.uniform(kb, (1, fan_out), jnp.float32, -bound, bound)
        return w, b

    w1, b1 = linear(ks[0], ks[1], state_dim, hidden)
    w2, b2 = linear(ks[2], ks[3], hidden, hidden)
    w3, b3 = linear(ks[4], ks[5], hidden, action_dim)
    logstd = jnp.zeros((1, action_dim), jnp.float32)
    return dict(w1=w1, b1=b1, w2=w2, b2=b2, w3=w3, b3=b3, logstd=logstd)


def _reference(state, params):
    h1 = jnp.maximum(state @ params["w1"] + params["b1"], 0.0)
    h2 = jnp.maximum(h1 @ params["w2"] + params["b2"], 0.0)
    return jnp.tanh(h2 @ params["w3"] + params["b3"])


if __name__ == "__main__":
    key = jax.random.PRNGKey(0)
    k_state, k_state2, k_params = jax.random.split(key, 3)

    state_dim, action_dim = 32, 8
    params = init_params(k_params, state_dim, action_dim)

    # Small test, B=2 (tail-only path: pads two rows up to one 8-row tile).
    B = 2
    state = jax.random.normal(k_state, (B, state_dim), jnp.float32)
    action_mean, logstd = actor_forward(state, params)
    jax.block_until_ready(action_mean)
    jax.block_until_ready(logstd)
    assert action_mean.shape == (B, action_dim)
    assert logstd.shape == (1, action_dim)
    assert jnp.allclose(action_mean, _reference(state, params), atol=1e-5, rtol=1e-5)

    # Multi-tile test: B not a multiple of the tile -> main grid (>1 step) on
    # the unpadded state plus a small tail call, then concatenation.
    B2 = 50
    state2 = jax.random.normal(k_state2, (B2, state_dim), jnp.float32)
    action_mean2, _ = actor_forward(state2, params, tb_max=16)
    jax.block_until_ready(action_mean2)
    assert action_mean2.shape == (B2, action_dim)
    assert jnp.allclose(action_mean2, _reference(state2, params), atol=1e-5, rtol=1e-5)

    # Divisible-batch test: single call, no padding or concat anywhere.
    B3 = 64
    state3 = jax.random.normal(k_state, (B3, state_dim), jnp.float32)
    action_mean3, _ = actor_forward(state3, params, tb_max=32)
    jax.block_until_ready(action_mean3)
    assert action_mean3.shape == (B3, action_dim)
    assert jnp.allclose(action_mean3, _reference(state3, params), atol=1e-5, rtol=1e-5)

    print("KERNEL_OK")
</pallas_src>

<mosaic_0001>
module attributes {stable_mosaic.version = 11 : i64} {
  func.func @actor_kernel(%arg0: i32, %arg1: memref<8x32xf32, #tpu.memory_space<vmem>>, %arg2: memref<32x64xf32, #tpu.memory_space<vmem>>, %arg3: memref<1x64xf32, #tpu.memory_space<vmem>>, %arg4: memref<64x64xf32, #tpu.memory_space<vmem>>, %arg5: memref<1x64xf32, #tpu.memory_space<vmem>>, %arg6: memref<64x128xf32, #tpu.memory_space<vmem>>, %arg7: memref<1x128xf32, #tpu.memory_space<vmem>>, %arg8: memref<8x8xf32, #tpu.memory_space<vmem>>) attributes {dimension_semantics = [#tpu.dimension_semantics<parallel>], iteration_bounds = array<i64: 1>, scalar_prefetch = 0 : i64, scratch_operands = 0 : i64, tpu.core_type = #tpu.core_type<tc>, window_params = [{transform_indices = @transform_0, window_bounds = array<i64: 8, 32>}, {pipeline_mode = #tpu.pipeline_mode<synchronous>, transform_indices = @transform_1, window_bounds = array<i64: 32, 64>}, {pipeline_mode = #tpu.pipeline_mode<synchronous>, transform_indices = @transform_2, window_bounds = array<i64: 1, 64>}, {pipeline_mode = #tpu.pipeline_mode<synchronous>, transform_indices = @transform_3, window_bounds = array<i64: 64, 64>}, {pipeline_mode = #tpu.pipeline_mode<synchronous>, transform_indices = @transform_4, window_bounds = array<i64: 1, 64>}, {pipeline_mode = #tpu.pipeline_mode<synchronous>, transform_indices = @transform_5, window_bounds = array<i64: 64, 128>}, {pipeline_mode = #tpu.pipeline_mode<synchronous>, transform_indices = @transform_6, window_bounds = array<i64: 1, 128>}, {transform_indices = @transform_7, window_bounds = array<i64: 8, 8>}]} {
    %c0 = arith.constant 0 : index
    %c0_0 = arith.constant 0 : index
    %0 = vector.load %arg1[%c0, %c0_0] : memref<8x32xf32, #tpu.memory_space<vmem>>, vector<8x32xf32>
    %c0_1 = arith.constant 0 : index
    %c0_2 = arith.constant 0 : index
    %1 = vector.load %arg2[%c0_1, %c0_2] : memref<32x64xf32, #tpu.memory_space<vmem>>, vector<32x64xf32>
    %cst = arith.constant dense<0.000000e+00> : vector<8x64xf32>
    %2 = tpu.matmul %0, %1, %cst {dimension_numbers = #tpu.dot_dimension_numbers<[1], [0], [0], [1], [0, 0, 1, 1], [], []>} : vector<8x32xf32>, vector<32x64xf32>, vector<8x64xf32> -> vector<8x64xf32>
    %c0_3 = arith.constant 0 : index
    %c0_4 = arith.constant 0 : index
    %3 = vector.load %arg3[%c0_3, %c0_4] : memref<1x64xf32, #tpu.memory_space<vmem>>, vector<1x64xf32>
    %4 = vector.broadcast %3 : vector<1x64xf32> to vector<8x64xf32>
    %5 = arith.addf %2, %4 : vector<8x64xf32>
    %cst_5 = arith.constant 0.000000e+00 : f32
    %6 = vector.broadcast %cst_5 : f32 to vector<8x64xf32>
    %7 = arith.maximumf %5, %6 : vector<8x64xf32>
    %c0_6 = arith.constant 0 : index
    %c0_7 = arith.constant 0 : index
    %8 = vector.load %arg4[%c0_6, %c0_7] : memref<64x64xf32, #tpu.memory_space<vmem>>, vector<64x64xf32>
    %cst_8 = arith.constant dense<0.000000e+00> : vector<8x64xf32>
    %9 = tpu.matmul %7, %8, %cst_8 {dimension_numbers = #tpu.dot_dimension_numbers<[1], [0], [0], [1], [0, 0, 1, 1], [], []>} : vector<8x64xf32>, vector<64x64xf32>, vector<8x64xf32> -> vector<8x64xf32>
    %c0_9 = arith.constant 0 : index
    %c0_10 = arith.constant 0 : index
    %10 = vector.load %arg5[%c0_9, %c0_10] : memref<1x64xf32, #tpu.memory_space<vmem>>, vector<1x64xf32>
    %11 = vector.broadcast %10 : vector<1x64xf32> to vector<8x64xf32>
    %12 = arith.addf %9, %11 : vector<8x64xf32>
    %cst_11 = arith.constant 0.000000e+00 : f32
    %13 = vector.broadcast %cst_11 : f32 to vector<8x64xf32>
    %14 = arith.maximumf %12, %13 : vector<8x64xf32>
    %c0_12 = arith.constant 0 : index
    %c0_13 = arith.constant 0 : index
    %15 = vector.load %arg6[%c0_12, %c0_13] : memref<64x128xf32, #tpu.memory_space<vmem>>, vector<64x128xf32>
    %cst_14 = arith.constant dense<0.000000e+00> : vector<8x128xf32>
    %16 = tpu.matmul %14, %15, %cst_14 {dimension_numbers = #tpu.dot_dimension_numbers<[1], [0], [0], [1], [0, 0, 1, 1], [], []>} : vector<8x64xf32>, vector<64x128xf32>, vector<8x128xf32> -> vector<8x128xf32>
    %c0_15 = arith.constant 0 : index
    %c0_16 = arith.constant 0 : index
    %17 = vector.load %arg7[%c0_15, %c0_16] : memref<1x128xf32, #tpu.memory_space<vmem>>, vector<1x128xf32>
    %18 = vector.broadcast %17 : vector<1x128xf32> to vector<8x128xf32>
    %19 = arith.addf %16, %18 : vector<8x128xf32>
    %20 = vector.extract_strided_slice %19 {offsets = [0, 0], sizes = [8, 8], strides = [1, 1]} : vector<8x128xf32> to vector<8x8xf32>
    %21 = math.tanh %20 : vector<8x8xf32>
    %c0_17 = arith.constant 0 : index
    %c0_18 = arith.constant 0 : index
    %22 = vector.load %arg8[%c0_17, %c0_18] : memref<8x8xf32, #tpu.memory_space<vmem>>, vector<8x8xf32>
    tpu.vector_store %arg8[%c0_17, %c0_18], %21 {strides = array<i32>} : memref<8x8xf32, #tpu.memory_space<vmem>>, vector<8x8xf32>,
    return
  }
  func.func @transform_0(%arg0: i32) -> (i32, i32) {
    %c0_i32 = arith.constant 0 : i32
    %c0_i32_0 = arith.constant 0 : i32
    return %arg0, %c0_i32 : i32, i32
  }
  func.func @transform_1(%arg0: i32) -> (i32, i32) {
    %c0_i32 = arith.constant 0 : i32
    %c0_i32_0 = arith.constant 0 : i32
    %c0_i32_1 = arith.constant 0 : i32
    return %c0_i32, %c0_i32_0 : i32, i32
  }
  func.func @transform_2(%arg0: i32) -> (i32, i32) {
    %c0_i32 = arith.constant 0 : i32
    %c0_i32_0 = arith.constant 0 : i32
    %c0_i32_1 = arith.constant 0 : i32
    return %c0_i32, %c0_i32_0 : i32, i32
  }
  func.func @transform_3(%arg0: i32) -> (i32, i32) {
    %c0_i32 = arith.constant 0 : i32
    %c0_i32_0 = arith.constant 0 : i32
    %c0_i32_1 = arith.constant 0 : i32
    return %c0_i32, %c0_i32_0 : i32, i32
  }
  func.func @transform_4(%arg0: i32) -> (i32, i32) {
    %c0_i32 = arith.constant 0 : i32
    %c0_i32_0 = arith.constant 0 : i32
    %c0_i32_1 = arith.constant 0 : i32
    return %c0_i32, %c0_i32_0 : i32, i32
  }
  func.func @transform_5(%arg0: i32) -> (i32, i32) {
    %c0_i32 = arith.constant 0 : i32
    %c0_i32_0 = arith.constant 0 : i32
    %c0_i32_1 = arith.constant 0 : i32
    return %c0_i32, %c0_i32_0 : i32, i32
  }
  func.func @transform_6(%arg0: i32) -> (i32, i32) {
    %c0_i32 = arith.constant 0 : i32
    %c0_i32_0 = arith.constant 0 : i32
    %c0_i32_1 = arith.constant 0 : i32
    return %c0_i32, %c0_i32_0 : i32, i32
  }
  func.func @transform_7(%arg0: i32) -> (i32, i32) {
    %c0_i32 = arith.constant 0 : i32
    %c0_i32_0 = arith.constant 0 : i32
    return %arg0, %c0_i32 : i32, i32
  }
}

</mosaic_0001>

<bundles_post_ra>
// kernel: tpu_custom_call.1
= control target key start
LH: loop header
LB: loop body
LE: loop exit
PB: predicated region body
PF: predicated region fallthrough
CT: control target
= control target key end

     0   :  { %12 = vsyncpa [#allocation3], 0  ;;  %s734_s0 = inlined_call_operand.hbm [shape: f32[8,32], index: 0, kind: input, shape index: {}]   ;;  %s735_s1 = inlined_call_operand.hbm [shape: f32[32,64], index: 1, kind: input, shape index: {}]   ;;  %s736_s2 = inlined_call_operand.vmem [shape: f32[1,64], index: 2, kind: input, shape index: {}]   ;;  %s737_s3 = inlined_call_operand.hbm [shape: f32[64,64], index: 3, kind: input, shape index: {}]   ;;  %s738_s4 = inlined_call_operand.vmem [shape: f32[1,64], index: 4, kind: input, shape index: {}]   ;;  %s739_s5 = inlined_call_operand.hbm [shape: f32[64,128], index: 5, kind: input, shape index: {}]   ;;  %s740_s6 = inlined_call_operand.vmem [shape: f32[1,128], index: 6, kind: input, shape index: {}]   ;;  %s741_s7 = inlined_call_operand.hbm [shape: f32[8,8], index: 7, kind: output, shape index: {}]  }
   0x1   :  { %13 = vsyncpa [#allocation6], 0 }
   0x2   :  { %14 = vsyncpa [#allocation9], 0 }
   0x3   :  { %15 = vsyncpa [#allocation4], 0  ;;  %s603_s24 = smov [#allocation5]   ;;  %s485_s28 = scalar_lea.hbm %s735_s1, 512 }
   0x4   :  { %s31_s25 = sshll.u32 %s603_s24, 4  ;;  %p486_p0 = scmp.ne.s32.totalorder %s735_s1, %s485_s28  ;;  %s32_s25 = int_to_ptr.vmem [resolvable:$true] %s31_s25 }
   0x5   :  { %p489_p1 = scmp.lt.u32.totalorder %s485_s28, %s735_s1 }
   0x7   :  { %p491_p2 = pnand %p489_p1, %p486_p0 }
   0x9   :  { %494 = shalt.err (!%p491_p2)
}
   0xa   :  { %s495_s10 = scalar_lea.vmem %s32_s25, 512  ;;  %p500_p4 = scmp.lt.s32.totalorder %s32_s25, %s32_s25 }
   0xb   :  { %p496_p3 = scmp.ne.s32.totalorder %s32_s25, %s495_s10  ;;  %p501_p5 = scmp.lt.s32.totalorder %s495_s10, %s495_s10 }
   0xd   :  { %p502_p6 = por %p501_p5, %p500_p4 }
   0xf   :  { %p503_p7 = pnand %p502_p6, %p496_p3 }
  0x11   :  { %506 = shalt.err (!%p503_p7)
}
  0x12   :  { %s604_s11 = smov 128   ;;  %s605_s12 = smov 8  }
  0x13   :  { %37 = dma.hbm_to_vmem [thread:$0]  %s735_s1, 512, %s32_s25, [#allocation6], %s604_s11, %s604_s11, %s605_s12  }
  0x14   :  { %s606_s15 = smov [#allocation2]   ;;  %s607_s17 = smov [#allocation7]  }
  0x15   :  { %s22_s16 = sshll.u32 %s606_s15, 4  ;;  %s45_s18 = sshll.u32 %s607_s17, 4  ;;  %s23_s16 = int_to_ptr.vmem [resolvable:$true] %s22_s16  ;;  %s46_s18 = int_to_ptr.vmem [resolvable:$true] %s45_s18 }
  0x16   :  { %s507_s21 = scalar_lea.hbm %s734_s0, 128 }
  0x17   :  { %p508_p8 = scmp.ne.s32.totalorder %s734_s0, %s507_s21  ;;  %p511_p9 = scmp.lt.u32.totalorder %s507_s21, %s734_s0 }
  0x19   :  { %p513_p10 = pnand %p511_p9, %p508_p8 }
  0x1b   :  { %516 = shalt.err (!%p513_p10)
}
  0x1c   :  { %s517_s1 = scalar_lea.vmem %s23_s16, 128  ;;  %p522_p12 = scmp.lt.s32.totalorder %s23_s16, %s23_s16 }
  0x1d   :  { %p518_p11 = scmp.ne.s32.totalorder %s23_s16, %s517_s1  ;;  %p523_p13 = scmp.lt.s32.totalorder %s517_s1, %s517_s1 }
  0x1f   :  { %p524_p0 = por %p523_p13, %p522_p12 }
  0x21   :  { %p525_p1 = pnand %p524_p0, %p518_p11 }
  0x23   :  { %528 = shalt.err (!%p525_p1)
}
  0x24   :  { %25 = dma.hbm_to_vmem [thread:$0]  %s734_s0, 128, %s23_s16, [#allocation3]  }
  0x25   :  { %s529_s30 = scalar_lea.hbm %s737_s3, 1024 }
  0x26   :  { %p530_p2 = scmp.ne.s32.totalorder %s737_s3, %s529_s30  ;;  %p533_p3 = scmp.lt.u32.totalorder %s529_s30, %s737_s3 }
  0x28   :  { %p535_p4 = pnand %p533_p3, %p530_p2 }
  0x2a   :  { %538 = shalt.err (!%p535_p4)
}
  0x2b   :  { %s539_s14 = scalar_lea.vmem %s46_s18, 1024  ;;  %p544_p6 = scmp.lt.s32.totalorder %s46_s18, %s46_s18 }
  0x2c   :  { %p540_p5 = scmp.ne.s32.totalorder %s46_s18, %s539_s14  ;;  %p545_p7 = scmp.lt.s32.totalorder %s539_s14, %s539_s14 }
  0x2e   :  { %p546_p8 = por %p545_p7, %p544_p6 }
  0x30   :  { %p547_p9 = pnand %p546_p8, %p540_p5 }
  0x32   :  { %550 = shalt.err (!%p547_p9)
}
  0x33   :  { %51 = dma.hbm_to_vmem [thread:$0]  %s737_s3, 1024, %s46_s18, [#allocation6], %s604_s11, %s604_s11, %s605_s12  }
  0x34   :  { %s608_s16 = smov [#allocation8]   ;;  %s551_s21 = scalar_lea.hbm %s739_s5, 1024 }
  0x35   :  { %s59_s17 = sshll.u32 %s608_s16, 4  ;;  %p552_p10 = scmp.ne.s32.totalorder %s739_s5, %s551_s21  ;;  %s60_s17 = int_to_ptr.vmem [resolvable:$true] %s59_s17 }
  0x36   :  { %p555_p11 = scmp.lt.u32.totalorder %s551_s21, %s739_s5 }
  0x38   :  { %p557_p12 = pnand %p555_p11, %p552_p10 }
  0x3a   :  { %560 = shalt.err (!%p557_p12)
}
  0x3b   :  { %s561_s1 = scalar_lea.vmem %s60_s17, 1024  ;;  %p566_p0 = scmp.lt.s32.totalorder %s60_s17, %s60_s17 }
  0x3c   :  { %p562_p13 = scmp.ne.s32.totalorder %s60_s17, %s561_s1  ;;  %p567_p1 = scmp.lt.s32.totalorder %s561_s1, %s561_s1 }
  0x3e   :  { %p568_p2 = por %p567_p1, %p566_p0 }
  0x40   :  { %p569_p3 = pnand %p568_p2, %p562_p13 }
  0x42   :  { %572 = shalt.err (!%p569_p3)
}
  0x43   :  { %65 = dma.hbm_to_vmem [thread:$0]  %s739_s5, 1024, %s60_s17, [#allocation9], %s604_s11, %s604_s11, %s605_s12  }
  0x44   :  { %595 = dma.done.wait [#allocation3], 128  }
  0x45   :  { %596 = vsyncadd [#allocation3], 4294967168 }
  0x46   :  { %597 = dma.done.wait [#allocation6], 1536  }
  0x47   :  { %598 = vsyncadd [#allocation6], 4294965760 }
  0x48   :  { %599 = dma.done.wait [#allocation9], 1024  }
  0x49   :  { %600 = vsyncadd [#allocation9], 4294966272  ;;  %v609_v0 = vmov 0.0|0.0   ;;  %vm610_vm0 = vmmov 0   ;;  %v611_v1 = vmov 0.0   ;;  %v81_v2 = vld [vmem:[#allocation5] sm:$0xff] }
  0x4a   :  { %443 = vmatprep.subr.bf16.mxu0 %v609_v0  ;;  %402 = vmatprep.mubr.msk.f32.mxu0 %vm610_vm0, %v611_v1  ;;  %v82_v3 = vld [vmem:[#allocation5 + $0x8] sm:$0xff]  ;;  %v83_v4 = vld [vmem:[#allocation5 + $0x10] sm:$0xff]  ;;  %v84_v6 = vld [vmem:[#allocation5 + $0x18] sm:$0xff]  ;;  %vm92_vm1 = vcmask 261120   ;;  %vm182_vm2 = vcmask 523264   ;;  %s612_s28 = smov [#allocation10]  }
  0x4b   :  { %449 = vmatprep.subr.bf16.mxu1 %v609_v0  ;;  %421 = vmatprep.mubr.msk.f32.mxu1 %vm610_vm0, %v611_v1  ;;  %v444_v5 = vpack.c.bf16 %v82_v3, %v81_v2  ;;  %v167_v7 = vld [vmem:[#allocation7] sm:$0xff]  ;;  %v168_v8 = vld [vmem:[#allocation7 + $0x8] sm:$0xff]  ;;  %v169_v9 = vld [vmem:[#allocation7 + $0x10] sm:$0xff]  ;;  %v447_v11 = vpack.c.bf16 %v84_v6, %v83_v4  ;;  %s354_s29 = sshll.u32 %s612_s28, 4  ;;  %vm346_vm3 = vcmask 64512   ;;  %s355_s29 = int_to_ptr.vmem [resolvable:$true] %s354_s29 }
  0x4c   :  { %v170_v10 = vld [vmem:[#allocation7 + $0x18] sm:$0xff]  ;;  %v450_v12 = vpack.c.bf16 %v168_v8, %v167_v7  ;;  %v171_v14 = vld [vmem:[#allocation7 + $0x20] sm:$0xff]  ;;  %v172_v15 = vld [vmem:[#allocation7 + $0x28] sm:$0xff]  ;;  %p578_p5 = scmp.lt.s32.totalorder %s355_s29, %s355_s29 }
  0x4d   :  { %445 = vmatpush3.bf16.msra.mxu0 %v444_v5  ;;  %v453_v13 = vpack.c.bf16 %v170_v10, %v169_v9  ;;  %v80_v16 = vld [vmem:[#allocation2] sm:$0xff]  ;;  %v456_v17 = vpack.c.bf16 %v172_v15, %v171_v14  ;;  %v173_v18 = vld [vmem:[#allocation7 + $0x30] sm:$0xff]  ;;  %v257_v21 = vld [vmem:[#allocation8] sm:$0xff] }
  0x4e   :  { %446 = vmatprep.subr.bf16.mxu0 %v609_v0  ;;  %451 = vmatpush3.bf16.msra.mxu1 %v450_v12  ;;  %v174_v19 = vld [vmem:[#allocation7 + $0x38] sm:$0xff]  ;;  %v258_v22 = vld [vmem:[#allocation8 + $0x8] sm:$0xff]  ;;  %v259_v23 = vld [vmem:[#allocation8 + $0x10] sm:$0xff] }
  0x4f   :  { %452 = vmatprep.subr.bf16.mxu1 %v609_v0  ;;  %v459_v20 = vpack.c.bf16 %v174_v19, %v173_v18  ;;  %v462_v24 = vpack.c.bf16 %v258_v22, %v257_v21  ;;  %v260_v25 = vld [vmem:[#allocation8 + $0x18] sm:$0xff]  ;;  %v261_v27 = vld [vmem:[#allocation8 + $0x20] sm:$0xff]  ;;  %v262_v28 = vld [vmem:[#allocation8 + $0x28] sm:$0xff] }
  0x50   :  { %v465_v26 = vpack.c.bf16 %v260_v25, %v259_v23  ;;  %v468_v29 = vpack.c.bf16 %v262_v28, %v261_v27  ;;  %v365_v30 = vld [vmem:[%s736_s2] ss:$0 sm:$0xff]  ;;  %v263_v35 = vld [vmem:[#allocation8 + $0x30] sm:$0xff] }
  0x51   :  { %448 = vmatpush3.bf16.msra.mxu0 %v447_v11  ;;  %v264_v36 = vld [vmem:[#allocation8 + $0x38] sm:$0xff] }
  0x52   :  { %461 = vmatprep.subr.bf16.mxu0 %v609_v0  ;;  %454 = vmatpush3.bf16.msra.mxu1 %v453_v13  ;;  %v471_v37 = vpack.c.bf16 %v264_v36, %v263_v35  ;;  %v367_v38 = vld [vmem:[%s738_s4] ss:$0 sm:$0xff]  ;;  %s573_s4 = scalar_lea.vmem %s355_s29, 128 }
  0x53   :  { %455 = vmatprep.subr.bf16.mxu1 %v609_v0  ;;  %v369_v43 = vld [vmem:[%s740_s6] ss:$0 sm:$0xff]  ;;  %p574_p4 = scmp.ne.s32.totalorder %s355_s29, %s573_s4  ;;  %p579_p6 = scmp.lt.s32.totalorder %s573_s4, %s573_s4 }
  0x54   :  { %403 = vmatmul.mubr.msk.f32.vlgmr.msra.gmra.mrb[0].mxu0 %vm92_vm1, %v80_v16 }
  0x55   :  { %440 = vmatprep.mubr.msk.f32.mxu0 %vm610_vm0, %v611_v1  ;;  %463 = vmatpush3.bf16.msra.mxu0 %v462_v24  ;;  %p580_p7 = por %p579_p6, %p578_p5 }
  0x56   :  { %457 = vmatpush3.bf16.msra.mxu1 %v456_v17  ;;  %464 = vmatprep.subr.bf16.mxu0 %v609_v0 }
  0x57   :  { %458 = vmatprep.subr.bf16.mxu1 %v609_v0  ;;  %p581_p8 = pnand %p580_p7, %p574_p4 }
  0x59   :  { %466 = vmatpush3.bf16.msra.mxu0 %v465_v26 }
  0x5a   :  { %460 = vmatpush3.bf16.msra.mxu1 %v459_v20  ;;  %467 = vmatprep.subr.bf16.mxu0 %v609_v0 }
  0x5d   :  { %469 = vmatpush3.bf16.msra.mxu0 %v468_v29 }
  0x5e   :  { %470 = vmatprep.subr.bf16.mxu0 %v609_v0 }
  0x61   :  { %472 = vmatpush3.bf16.msra.mxu0 %v471_v37 }
 0x127   :  { %v162_v31 = vpop.f32.mrb[0].mxu0 }
 0x128   :  { %v163_v32 = vadd.f32 %v365_v30, %v162_v31  ;;  %v404_v33 = vpop.f32.mrb[1].mxu0 }
 0x12a   :  { %v166_v34 = vmax.f32 %v163_v32, 0.0 }
 0x12c   :  { %422 = vmatmul.mubr.msk.f32.vlgmr.msra.gmra.mrb[0].mxu1 %vm182_vm2, %v166_v34 }
 0x1ff   :  { %v252_v39 = vpop.f32.mrb[0].mxu1 }
 0x200   :  { %v253_v40 = vadd.f32 %v367_v38, %v252_v39  ;;  %v423_v41 = vpop.f32.mrb[1].mxu1 }
 0x202   :  { %v256_v42 = vmax.f32 %v253_v40, 0.0 }
 0x204   :  { %441 = vmatmul.mubr.msk.f32.vlgmr.msra.gmra.mrb[2].mxu0 %vm182_vm2, %v256_v42 }
 0x2d7   :  { %v341_v44 = vpop.f32.mrb[2].mxu0 }
 0x2d8   :  { %v342_v45 = vadd.f32 %v369_v43, %v341_v44  ;;  %v442_v46 = vpop.f32.mrb[3].mxu0 }
 0x2da   :  { %483 = vtanh.f32 %v342_v45 }
 0x2e4   :  { %v484_v47 = vpop.eup %483 }
 0x2e5   :  { %347 = vst.msk [vmem:[#allocation10] sm:$0xff] %vm346_vm3, %v484_v47 }
 0x2e6   :  { %584 = shalt.err (!%p581_p8)
}
 0x2e7   :  { %s585_s6 = scalar_lea.hbm %s741_s7, 128 }
 0x2e8   :  { %p586_p9 = scmp.ne.s32.totalorder %s741_s7, %s585_s6  ;;  %p589_p10 = scmp.lt.u32.totalorder %s585_s6, %s741_s7 }
 0x2ea   :  { %p591_p11 = pnand %p589_p10, %p586_p9 }
 0x2ec   :  { %594 = shalt.err (!%p591_p11)
}
 0x2ed   :  { %357 = dma.vmem_to_hbm [thread:$0]  %s355_s29, 128, %s741_s7, [#allocation4]  }
 0x2ee   :  { %601 = dma.done.wait [#allocation4], 128  }
 0x2ef   :  { %602 = vsyncadd [#allocation4], 4294967168 }
 0x2f0   :  { %361 = vsyncpa [#allocation3], 1 }
 0x2f1   :  { %362 = vsyncpa [#allocation6], 1 }
 0x2f2   :  { %363 = vsyncpa [#allocation9], 1 }
 0x2f3   :  { %364 = vsyncpa [#allocation4], 1 }

</bundles_post_ra>
